<compile_context>
chip_gen: v7x
topology: tpu7x:2x2x1
jax: 0.10.0
libtpu: 0.0.40
codegen_flags: <defaults>
</compile_context>

<pallas_src>
import jax
import jax.numpy as jnp
from jax.experimental import pallas as pl
from jax.experimental.pallas import tpu as pltpu


def _round_up(a, m):
    return ((a + m - 1) // m) * m


def _net_kernel(x_ref, w1_ref, b1_ref, w2_ref, b2_ref, o_ref):
    # x_ref:  (TB, D)   f32 flattened input tile
    # w1_ref: (D, H1)   bf16 fc1 weight, pre-transposed to (in, out) at init
    # b1_ref: (1, H1)   f32 fc1 bias
    # w2_ref: (H1, Cp)  bf16 fc2 weight, pre-transposed, out-dim padded to a multiple of 128
    # b2_ref: (1, Cp)   f32 fc2 bias, padded entries = -1e30
    # o_ref:  (TB, Cp)  bf16 log-probabilities (padded columns huge-negative, sliced off outside)
    x = x_ref[...].astype(jnp.bfloat16)

    # fc1 + ReLU (MXU-native (M,K) x (K,N) contraction; f32 accumulate).
    h = jnp.dot(x, w1_ref[...], preferred_element_type=jnp.float32) + b1_ref[...]
    h = jnp.maximum(h, 0.0)

    # dropout(0.5): identity in eval mode.

    # fc2 (same native contraction form).
    logits = jnp.dot(h.astype(jnp.bfloat16), w2_ref[...],
                     preferred_element_type=jnp.float32) + b2_ref[...]

    # log_softmax along dim=1 (numerically stable).  Padded columns carry f32 bias -1e30:
    # they never win the max and exp(shifted) underflows to exactly 0, so the
    # log-sum-exp over the real classes is untouched.
    m = jnp.max(logits, axis=-1, keepdims=True)
    shifted = logits - m
    lse = jnp.log(jnp.sum(jnp.exp(shifted), axis=-1, keepdims=True))
    o_ref[...] = (shifted - lse).astype(o_ref.dtype)


def prepare_params(w1, b1, w2, b2, lane_pad=128):
    """One-time (model-init) parameter preparation: bf16 weights pre-transposed to
    (in, out) layout, fc2 out-dim padded to a lane-dense multiple of 128 with zero
    weight columns and -1e30 (f32!) bias for the padded classes."""
    H1, D = w1.shape
    C2 = w2.shape[0]
    Cp = max(lane_pad, _round_up(C2, 128))

    w1t = jnp.asarray(w1, jnp.float32).T.astype(jnp.bfloat16)        # (D, H1)
    w2pt = (jnp.zeros((H1, Cp), jnp.float32)
            .at[:, :C2].set(jnp.asarray(w2, jnp.float32).T)
            .astype(jnp.bfloat16))                                   # (H1, Cp)
    b2p = jnp.full((Cp,), -1e30, jnp.float32).at[:C2].set(b2.astype(jnp.float32))
    return (
        w1t,                                        # (D, H1)  bf16
        b1.reshape(1, H1).astype(jnp.float32),      # (1, H1)  f32
        w2pt,                                       # (H1, Cp) bf16
        b2p.reshape(1, Cp),                         # (1, Cp)  f32
    )


def tensorized_net_forward(x_nchw, params, num_classes=10):
    """x_nchw: (B, C, H, W) float32. params: output of prepare_params."""
    w1t, b1r, w2pt, b2p = params
    B = x_nchw.shape[0]
    x = x_nchw.reshape(B, -1).astype(jnp.float32)   # torch.flatten(x, 1)
    D = x.shape[1]
    H1 = w1t.shape[1]
    Cp = w2pt.shape[1]

    # Batch tiling:
    #  * tiny batches: one full-extent tile (degenerate grid=(1,)).
    #  * large batches: tiles of up to 512 rows, chosen so the "parallel" grid has at
    #    least 2 steps (v7x has 2 TensorCores; v5e/v6e are unaffected by the >=2 rule).
    if B <= 128:
        TB, Bp = B, B
    else:
        bp128 = _round_up(B, 128)
        TB = min(512, max(128, _round_up(bp128 // 2, 128)))
        Bp = _round_up(B, TB)
    if Bp != B:
        x = jnp.pad(x, ((0, Bp - B), (0, 0)))
    grid = (Bp // TB,)

    flops = 2 * Bp * D * H1 + 2 * Bp * H1 * Cp
    transcendentals = Bp * Cp + Bp                       # exp + log
    bytes_accessed = (Bp * D * 4                         # x (f32 in)
                      + int(w1t.size) * 2 + int(b1r.size) * 4
                      + int(w2pt.size) * 2 + int(b2p.size) * 4
                      + Bp * Cp * 2)                     # bf16 output

    out = pl.pallas_call(
        _net_kernel,
        out_shape=jax.ShapeDtypeStruct((Bp, Cp), jnp.bfloat16),
        grid=grid,
        in_specs=[
            pl.BlockSpec((TB, D), lambda i: (i, 0)),     # x tile follows the grid
            pl.BlockSpec((D, H1), lambda i: (0, 0)),     # weights stay resident in VMEM
            pl.BlockSpec((1, H1), lambda i: (0, 0)),
            pl.BlockSpec((H1, Cp), lambda i: (0, 0)),
            pl.BlockSpec((1, Cp), lambda i: (0, 0)),
        ],
        out_specs=pl.BlockSpec((TB, Cp), lambda i: (i, 0)),
        compiler_params=pltpu.CompilerParams(
            dimension_semantics=("parallel",)),
        cost_estimate=pl.CostEstimate(
            flops=flops,
            transcendentals=transcendentals,
            bytes_accessed=bytes_accessed),
    )(x, w1t, b1r, w2pt, b2p)

    # Drop batch padding and the lane-padding classes; upcast outside the kernel.
    return out[:B, :num_classes].astype(jnp.float32)


def _reference(x_nchw, w1, b1, w2, b2):
    x = x_nchw.reshape(x_nchw.shape[0], -1)
    h = jnp.maximum(x @ w1.T + b1, 0.0)
    logits = h @ w2.T + b2
    return jax.nn.log_softmax(logits, axis=1)


if __name__ == "__main__":
    key = jax.random.PRNGKey(0)
    k_x, k_w1, k_b1, k_w2, k_b2, k_xb = jax.random.split(key, 6)

    # Small shapes consistent with the forward pass:
    #   x: (batch=2, channels=1, 16, 16) -> flatten -> D=256
    #   fc1: 256 -> 512   (hidden matches the unused BatchNorm1d(512))
    #   fc2: 512 -> 10    (MNIST classes)
    B, C, Hs, Ws = 2, 1, 16, 16
    D, HID, NCLS = C * Hs * Ws, 512, 10

    x = jax.random.normal(k_x, (B, C, Hs, Ws), dtype=jnp.float32)
    w1 = 0.05 * jax.random.normal(k_w1, (HID, D), dtype=jnp.float32)
    b1 = 0.01 * jax.random.normal(k_b1, (HID,), dtype=jnp.float32)
    w2 = 0.05 * jax.random.normal(k_w2, (NCLS, HID), dtype=jnp.float32)
    b2 = 0.01 * jax.random.normal(k_b2, (NCLS,), dtype=jnp.float32)

    params = prepare_params(w1, b1, w2, b2)            # one-time init-style conversion

    # Small-batch (single tile) path.
    out = tensorized_net_forward(x, params, num_classes=NCLS)
    out = jax.block_until_ready(out)
    ref = _reference(x, w1, b1, w2, b2)
    assert out.shape == (B, NCLS)
    assert bool(jnp.all(jnp.isfinite(out))), "non-finite output (small batch)"
    # bf16 matmul operands + bf16 output (f32 accumulate) -> loosened tolerance vs f32 ref.
    assert jnp.allclose(out, ref, atol=5e-2, rtol=5e-2), "mismatch vs reference (small batch)"

    # Larger batch exercising the tiled / padded / multi-step-parallel-grid path.
    BB = 384
    xb = jax.random.normal(k_xb, (BB, C, Hs, Ws), dtype=jnp.float32)
    out_b = tensorized_net_forward(xb, params, num_classes=NCLS)
    out_b = jax.block_until_ready(out_b)
    ref_b = _reference(xb, w1, b1, w2, b2)
    assert out_b.shape == (BB, NCLS)
    assert bool(jnp.all(jnp.isfinite(out_b))), "non-finite output (tiled batch)"
    assert jnp.allclose(out_b, ref_b, atol=5e-2, rtol=5e-2), "mismatch vs reference (tiled batch)"

    print("KERNEL_OK")
</pallas_src>

<mosaic_0001>
module attributes {stable_mosaic.version = 11 : i64} {
  func.func @_net_kernel(%arg0: i32, %arg1: memref<2x256xf32, #tpu.memory_space<vmem>>, %arg2: memref<256x512xbf16, #tpu.memory_space<vmem>>, %arg3: memref<1x512xf32, #tpu.memory_space<vmem>>, %arg4: memref<512x128xbf16, #tpu.memory_space<vmem>>, %arg5: memref<1x128xf32, #tpu.memory_space<vmem>>, %arg6: memref<2x128xbf16, #tpu.memory_space<vmem>>) attributes {dimension_semantics = [#tpu.dimension_semantics<parallel>], iteration_bounds = array<i64: 1>, scalar_prefetch = 0 : i64, scratch_operands = 0 : i64, tpu.core_type = #tpu.core_type<tc>, window_params = [{transform_indices = @transform_0, window_bounds = array<i64: 2, 256>}, {pipeline_mode = #tpu.pipeline_mode<synchronous>, transform_indices = @transform_1, window_bounds = array<i64: 256, 512>}, {pipeline_mode = #tpu.pipeline_mode<synchronous>, transform_indices = @transform_2, window_bounds = array<i64: 1, 512>}, {pipeline_mode = #tpu.pipeline_mode<synchronous>, transform_indices = @transform_3, window_bounds = array<i64: 512, 128>}, {pipeline_mode = #tpu.pipeline_mode<synchronous>, transform_indices = @transform_4, window_bounds = array<i64: 1, 128>}, {transform_indices = @transform_5, window_bounds = array<i64: 2, 128>}]} {
    %c0 = arith.constant 0 : index
    %c0_0 = arith.constant 0 : index
    %0 = vector.load %arg1[%c0, %c0_0] : memref<2x256xf32, #tpu.memory_space<vmem>>, vector<2x256xf32>
    %1 = arith.truncf %0 : vector<2x256xf32> to vector<2x256xbf16>
    %c0_1 = arith.constant 0 : index
    %c0_2 = arith.constant 0 : index
    %2 = vector.load %arg2[%c0_1, %c0_2] : memref<256x512xbf16, #tpu.memory_space<vmem>>, vector<256x512xbf16>
    %cst = arith.constant dense<0.000000e+00> : vector<2x512xf32>
    %3 = tpu.matmul %1, %2, %cst {dimension_numbers = #tpu.dot_dimension_numbers<[1], [0], [0], [1], [0, 0, 1, 1], [], []>} : vector<2x256xbf16>, vector<256x512xbf16>, vector<2x512xf32> -> vector<2x512xf32>
    %c0_3 = arith.constant 0 : index
    %c0_4 = arith.constant 0 : index
    %4 = vector.load %arg3[%c0_3, %c0_4] : memref<1x512xf32, #tpu.memory_space<vmem>>, vector<1x512xf32>
    %5 = vector.broadcast %4 : vector<1x512xf32> to vector<2x512xf32>
    %6 = arith.addf %3, %5 : vector<2x512xf32>
    %cst_5 = arith.constant 0.000000e+00 : f32
    %7 = vector.broadcast %cst_5 : f32 to vector<2x512xf32>
    %8 = arith.maximumf %6, %7 : vector<2x512xf32>
    %9 = arith.truncf %8 : vector<2x512xf32> to vector<2x512xbf16>
    %c0_6 = arith.constant 0 : index
    %c0_7 = arith.constant 0 : index
    %10 = vector.load %arg4[%c0_6, %c0_7] : memref<512x128xbf16, #tpu.memory_space<vmem>>, vector<512x128xbf16>
    %cst_8 = arith.constant dense<0.000000e+00> : vector<2x128xf32>
    %11 = tpu.matmul %9, %10, %cst_8 {dimension_numbers = #tpu.dot_dimension_numbers<[1], [0], [0], [1], [0, 0, 1, 1], [], []>} : vector<2x512xbf16>, vector<512x128xbf16>, vector<2x128xf32> -> vector<2x128xf32>
    %c0_9 = arith.constant 0 : index
    %c0_10 = arith.constant 0 : index
    %12 = vector.load %arg5[%c0_9, %c0_10] : memref<1x128xf32, #tpu.memory_space<vmem>>, vector<1x128xf32>
    %13 = vector.broadcast %12 : vector<1x128xf32> to vector<2x128xf32>
    %14 = arith.addf %11, %13 : vector<2x128xf32>
    %cst_11 = arith.constant dense<0xFF800000> : vector<2xf32>
    %15 = vector.multi_reduction <maximumf>, %14, %cst_11 [1] : vector<2x128xf32> to vector<2xf32>
    %16 = vector.shape_cast %15 : vector<2xf32> to vector<2x1xf32>
    %17 = vector.broadcast %16 : vector<2x1xf32> to vector<2x128xf32>
    %18 = arith.subf %14, %17 : vector<2x128xf32>
    %19 = math.exp %18 : vector<2x128xf32>
    %cst_12 = arith.constant dense<0.000000e+00> : vector<2xf32>
    %20 = vector.multi_reduction <add>, %19, %cst_12 [1] : vector<2x128xf32> to vector<2xf32>
    %21 = vector.shape_cast %20 : vector<2xf32> to vector<2x1xf32>
    %22 = math.log %21 : vector<2x1xf32>
    %23 = vector.broadcast %22 : vector<2x1xf32> to vector<2x128xf32>
    %24 = arith.subf %18, %23 : vector<2x128xf32>
    %25 = arith.truncf %24 : vector<2x128xf32> to vector<2x128xbf16>
    %c0_13 = arith.constant 0 : index
    %c0_14 = arith.constant 0 : index
    %26 = vector.load %arg6[%c0_13, %c0_14] : memref<2x128xbf16, #tpu.memory_space<vmem>>, vector<2x128xbf16>
    tpu.vector_store %arg6[%c0_13, %c0_14], %25 {strides = array<i32>} : memref<2x128xbf16, #tpu.memory_space<vmem>>, vector<2x128xbf16>,
    return
  }
  func.func @transform_0(%arg0: i32) -> (i32, i32) {
    %c0_i32 = arith.constant 0 : i32
    %c0_i32_0 = arith.constant 0 : i32
    return %arg0, %c0_i32 : i32, i32
  }
  func.func @transform_1(%arg0: i32) -> (i32, i32) {
    %c0_i32 = arith.constant 0 : i32
    %c0_i32_0 = arith.constant 0 : i32
    %c0_i32_1 = arith.constant 0 : i32
    return %c0_i32, %c0_i32_0 : i32, i32
  }
  func.func @transform_2(%arg0: i32) -> (i32, i32) {
    %c0_i32 = arith.constant 0 : i32
    %c0_i32_0 = arith.constant 0 : i32
    %c0_i32_1 = arith.constant 0 : i32
    return %c0_i32, %c0_i32_0 : i32, i32
  }
  func.func @transform_3(%arg0: i32) -> (i32, i32) {
    %c0_i32 = arith.constant 0 : i32
    %c0_i32_0 = arith.constant 0 : i32
    %c0_i32_1 = arith.constant 0 : i32
    return %c0_i32, %c0_i32_0 : i32, i32
  }
  func.func @transform_4(%arg0: i32) -> (i32, i32) {
    %c0_i32 = arith.constant 0 : i32
    %c0_i32_0 = arith.constant 0 : i32
    %c0_i32_1 = arith.constant 0 : i32
    return %c0_i32, %c0_i32_0 : i32, i32
  }
  func.func @transform_5(%arg0: i32) -> (i32, i32) {
    %c0_i32 = arith.constant 0 : i32
    %c0_i32_0 = arith.constant 0 : i32
    return %arg0, %c0_i32 : i32, i32
  }
}

</mosaic_0001>

<bundles_post_ra>
// kernel: tpu_custom_call.1
= control target key start
LH: loop header
LB: loop body
LE: loop exit
PB: predicated region body
PF: predicated region fallthrough
CT: control target
= control target key end

     0   :  { %10 = vsyncpa [#allocation3], 0  ;;  %s1413_s0 = inlined_call_operand.hbm [shape: f32[2,256], index: 0, kind: input, shape index: {}]   ;;  %s1414_s1 = inlined_call_operand.hbm [shape: bf16[256,512], index: 1, kind: input, shape index: {}]   ;;  %s1415_s2 = inlined_call_operand.vmem [shape: f32[1,512], index: 2, kind: input, shape index: {}]   ;;  %s1416_s3 = inlined_call_operand.hbm [shape: bf16[512,128], index: 3, kind: input, shape index: {}]   ;;  %s1417_s4 = inlined_call_operand.vmem [shape: f32[1,128], index: 4, kind: input, shape index: {}]   ;;  %s1418_s5 = inlined_call_operand.hbm [shape: bf16[2,128], index: 5, kind: output, shape index: {}]  }
   0x1   :  { %11 = vsyncpa [#allocation6], 0 }
   0x2   :  { %12 = vsyncpa [#allocation4], 0  ;;  %s1321_s18 = smov [#allocation5]   ;;  %s1227_s22 = scalar_lea.hbm %s1414_s1, 8192 }
   0x3   :  { %s28_s19 = sshll.u32 %s1321_s18, 4  ;;  %p1228_p0 = scmp.ne.s32.totalorder %s1414_s1, %s1227_s22  ;;  %s29_s19 = int_to_ptr.vmem [resolvable:$true] %s28_s19 }
   0x4   :  { %p1231_p1 = scmp.lt.u32.totalorder %s1227_s22, %s1414_s1 }
   0x6   :  { %p1233_p2 = pnand %p1231_p1, %p1228_p0 }
   0x8   :  { %1236 = shalt.err (!%p1233_p2)
}
   0x9   :  { %s1237_s27 = scalar_lea.vmem %s29_s19, 8192  ;;  %p1242_p4 = scmp.lt.s32.totalorder %s29_s19, %s29_s19 }
   0xa   :  { %p1238_p3 = scmp.ne.s32.totalorder %s29_s19, %s1237_s27  ;;  %p1243_p5 = scmp.lt.s32.totalorder %s1237_s27, %s1237_s27 }
   0xc   :  { %p1244_p6 = por %p1243_p5, %p1242_p4 }
   0xe   :  { %p1245_p7 = pnand %p1244_p6, %p1238_p3 }
  0x10   :  { %1248 = shalt.err (!%p1245_p7)
}
  0x11   :  { %s1322_s28 = smov 256   ;;  %s1323_s29 = smov 16  }
  0x12   :  { %34 = dma.hbm_to_vmem [thread:$0]  %s1414_s1, 8192, %s29_s19, [#allocation6], %s1322_s28, %s1322_s28, %s1323_s29  }
  0x13   :  { %s1324_s7 = smov [#allocation2]   ;;  %s1325_s9 = smov [#allocation7]  }
  0x14   :  { %s19_s8 = sshll.u32 %s1324_s7, 4  ;;  %s42_s10 = sshll.u32 %s1325_s9, 4  ;;  %s20_s8 = int_to_ptr.vmem [resolvable:$true] %s19_s8  ;;  %s43_s10 = int_to_ptr.vmem [resolvable:$true] %s42_s10 }
  0x15   :  { %s1249_s13 = scalar_lea.hbm %s1413_s0, 64 }
  0x16   :  { %p1250_p8 = scmp.ne.s32.totalorder %s1413_s0, %s1249_s13  ;;  %p1253_p9 = scmp.lt.u32.totalorder %s1249_s13, %s1413_s0 }
  0x18   :  { %p1255_p10 = pnand %p1253_p9, %p1250_p8 }
  0x1a   :  { %1258 = shalt.err (!%p1255_p10)
}
  0x1b   :  { %s1259_s1 = scalar_lea.vmem %s20_s8, 64  ;;  %p1264_p12 = scmp.lt.s32.totalorder %s20_s8, %s20_s8 }
  0x1c   :  { %p1260_p11 = scmp.ne.s32.totalorder %s20_s8, %s1259_s1  ;;  %p1265_p13 = scmp.lt.s32.totalorder %s1259_s1, %s1259_s1 }
  0x1e   :  { %p1266_p0 = por %p1265_p13, %p1264_p12 }
  0x20   :  { %p1267_p1 = pnand %p1266_p0, %p1260_p11 }
  0x22   :  { %1270 = shalt.err (!%p1267_p1)
}
  0x23   :  { %22 = dma.hbm_to_vmem [thread:$0]  %s1413_s0, 64, %s20_s8, [#allocation3]  }
  0x24   :  { %s1271_s22 = scalar_lea.hbm %s1416_s3, 4096 }
  0x25   :  { %p1272_p2 = scmp.ne.s32.totalorder %s1416_s3, %s1271_s22  ;;  %p1275_p3 = scmp.lt.u32.totalorder %s1271_s22, %s1416_s3 }
  0x27   :  { %p1277_p4 = pnand %p1275_p3, %p1272_p2 }
  0x29   :  { %1280 = shalt.err (!%p1277_p4)
}
  0x2a   :  { %s1281_s27 = scalar_lea.vmem %s43_s10, 4096  ;;  %p1286_p6 = scmp.lt.s32.totalorder %s43_s10, %s43_s10 }
  0x2b   :  { %p1282_p5 = scmp.ne.s32.totalorder %s43_s10, %s1281_s27  ;;  %p1287_p7 = scmp.lt.s32.totalorder %s1281_s27, %s1281_s27 }
  0x2d   :  { %p1288_p8 = por %p1287_p7, %p1286_p6 }
  0x2f   :  { %p1289_p9 = pnand %p1288_p8, %p1282_p5 }
  0x31   :  { %1292 = shalt.err (!%p1289_p9)
}
  0x32   :  { %s1326_s0 = smov 64   ;;  %s1327_s28 = smov 4  }
  0x33   :  { %48 = dma.hbm_to_vmem [thread:$0]  %s1416_s3, 4096, %s43_s10, [#allocation6], %s1326_s0, %s1326_s0, %s1327_s28  }
  0x34   :  { %1315 = dma.done.wait [#allocation3], 64  }
  0x35   :  { %1316 = vsyncadd [#allocation3], 4294967232 }
  0x36   :  { %1317 = dma.done.wait [#allocation6], 12288  }
  0x37   :  { %1318 = vsyncadd [#allocation6], 4294955008  ;;  %v1095_v0 = vld [vmem:[#allocation5 + $0x4] ss:$16 sps:$4 sm:$0xff]   ;;  %v1097_v1 = vld [vmem:[#allocation5 + $0xc] ss:$16 sps:$4 sm:$0xff]  }
  0x38   :  { %481 = vmatprep.subr.bf16.mxu0 %v1095_v0  ;;  %v1099_v2 = vld [vmem:[#allocation5] ss:$16 sps:$4 sm:$0xff]   ;;  %v1100_v3 = vld [vmem:[#allocation5 + $0x8] ss:$16 sps:$4 sm:$0xff]   ;;  %522 = vmatprep.subr.bf16.mxu1 %v1097_v1  ;;  %v1101_v4 = vld [vmem:[#allocation5 + $0x24] ss:$16 sps:$4 sm:$0xff]  }
  0x39   :  { %482 = vmatpush1.bf16.msra.mxu0 %v1099_v2  ;;  %523 = vmatpush1.bf16.msra.mxu1 %v1100_v3  ;;  %v1103_v5 = vld [vmem:[#allocation5 + $0x2c] ss:$16 sps:$4 sm:$0xff]   ;;  %v1105_v6 = vld [vmem:[#allocation5 + $0x20] ss:$16 sps:$4 sm:$0xff]   ;;  %v1106_v7 = vld [vmem:[#allocation5 + $0x28] ss:$16 sps:$4 sm:$0xff]  }
  0x3a   :  { %483 = vmatprep.subr.bf16.mxu0 %v1101_v4  ;;  %524 = vmatprep.subr.bf16.mxu1 %v1103_v5  ;;  %v1107_v8 = vld [vmem:[#allocation5 + $0x44] ss:$16 sps:$4 sm:$0xff]   ;;  %v1109_v9 = vld [vmem:[#allocation5 + $0x4c] ss:$16 sps:$4 sm:$0xff]   ;;  %v1111_v10 = vld [vmem:[#allocation5 + $0x40] ss:$16 sps:$4 sm:$0xff]  }
  0x3b   :  { %v1112_v11 = vld [vmem:[#allocation5 + $0x48] ss:$16 sps:$4 sm:$0xff]   ;;  %v1113_v12 = vld [vmem:[#allocation5 + $0x64] ss:$16 sps:$4 sm:$0xff]   ;;  %v1115_v13 = vld [vmem:[#allocation5 + $0x6c] ss:$16 sps:$4 sm:$0xff]  }
  0x3c   :  { %v1117_v14 = vld [vmem:[#allocation5 + $0x60] ss:$16 sps:$4 sm:$0xff]   ;;  %v1118_v15 = vld [vmem:[#allocation5 + $0x68] ss:$16 sps:$4 sm:$0xff]   ;;  %v1119_v16 = vld [vmem:[#allocation5 + $0x84] ss:$16 sps:$4 sm:$0xff]  }
  0x3d   :  { %484 = vmatpush1.bf16.msra.mxu0 %v1105_v6  ;;  %525 = vmatpush1.bf16.msra.mxu1 %v1106_v7  ;;  %v1121_v17 = vld [vmem:[#allocation5 + $0x8c] ss:$16 sps:$4 sm:$0xff]   ;;  %v1123_v18 = vld [vmem:[#allocation5 + $0x80] ss:$16 sps:$4 sm:$0xff]   ;;  %v1124_v19 = vld [vmem:[#allocation5 + $0x88] ss:$16 sps:$4 sm:$0xff]  }
  0x3e   :  { %485 = vmatprep.subr.bf16.mxu0 %v1107_v8  ;;  %526 = vmatprep.subr.bf16.mxu1 %v1109_v9  ;;  %v1125_v20 = vld [vmem:[#allocation5 + $0xa4] ss:$16 sps:$4 sm:$0xff]   ;;  %v1127_v21 = vld [vmem:[#allocation5 + $0xac] ss:$16 sps:$4 sm:$0xff]   ;;  %v1129_v22 = vld [vmem:[#allocation5 + $0xa0] ss:$16 sps:$4 sm:$0xff]  }
  0x3f   :  { %v1130_v23 = vld [vmem:[#allocation5 + $0xa8] ss:$16 sps:$4 sm:$0xff]   ;;  %v1131_v24 = vld [vmem:[#allocation5 + $0xc4] ss:$16 sps:$4 sm:$0xff]   ;;  %v1133_v25 = vld [vmem:[#allocation5 + $0xcc] ss:$16 sps:$4 sm:$0xff]  }
  0x40   :  { %v1135_v26 = vld [vmem:[#allocation5 + $0xc0] ss:$16 sps:$4 sm:$0xff]   ;;  %v1136_v27 = vld [vmem:[#allocation5 + $0xc8] ss:$16 sps:$4 sm:$0xff]   ;;  %v1137_v28 = vld [vmem:[#allocation5 + $0xe4] ss:$16 sps:$4 sm:$0xff]  }
  0x41   :  { %486 = vmatpush1.bf16.msra.mxu0 %v1111_v10  ;;  %527 = vmatpush1.bf16.msra.mxu1 %v1112_v11  ;;  %v1139_v29 = vld [vmem:[#allocation5 + $0xec] ss:$16 sps:$4 sm:$0xff]   ;;  %v1141_v30 = vld [vmem:[#allocation5 + $0xe0] ss:$16 sps:$4 sm:$0xff]   ;;  %v1142_v31 = vld [vmem:[#allocation5 + $0xe8] ss:$16 sps:$4 sm:$0xff]  }
  0x42   :  { %487 = vmatprep.subr.bf16.mxu0 %v1113_v12  ;;  %528 = vmatprep.subr.bf16.mxu1 %v1115_v13  ;;  %v1143_v32 = vld [vmem:[#allocation5 + $0x104] ss:$16 sps:$4 sm:$0xff]   ;;  %v1145_v33 = vld [vmem:[#allocation5 + $0x10c] ss:$16 sps:$4 sm:$0xff]   ;;  %v1147_v34 = vld [vmem:[#allocation5 + $0x100] ss:$16 sps:$4 sm:$0xff]  }
  0x43   :  { %v1148_v35 = vld [vmem:[#allocation5 + $0x108] ss:$16 sps:$4 sm:$0xff]   ;;  %v1149_v36 = vld [vmem:[#allocation5 + $0x124] ss:$16 sps:$4 sm:$0xff]   ;;  %v1151_v37 = vld [vmem:[#allocation5 + $0x12c] ss:$16 sps:$4 sm:$0xff]  }
  0x44   :  { %v1153_v38 = vld [vmem:[#allocation5 + $0x120] ss:$16 sps:$4 sm:$0xff]   ;;  %v1154_v39 = vld [vmem:[#allocation5 + $0x128] ss:$16 sps:$4 sm:$0xff]   ;;  %v1155_v40 = vld [vmem:[#allocation5 + $0x144] ss:$16 sps:$4 sm:$0xff]  }
  0x45   :  { %488 = vmatpush1.bf16.msra.mxu0 %v1117_v14  ;;  %529 = vmatpush1.bf16.msra.mxu1 %v1118_v15  ;;  %v1157_v41 = vld [vmem:[#allocation5 + $0x14c] ss:$16 sps:$4 sm:$0xff]   ;;  %v1159_v42 = vld [vmem:[#allocation5 + $0x140] ss:$16 sps:$4 sm:$0xff]   ;;  %v1160_v43 = vld [vmem:[#allocation5 + $0x148] ss:$16 sps:$4 sm:$0xff]  }
  0x46   :  { %489 = vmatprep.subr.bf16.mxu0 %v1119_v16  ;;  %530 = vmatprep.subr.bf16.mxu1 %v1121_v17  ;;  %v1161_v44 = vld [vmem:[#allocation5 + $0x164] ss:$16 sps:$4 sm:$0xff]   ;;  %v1163_v45 = vld [vmem:[#allocation5 + $0x16c] ss:$16 sps:$4 sm:$0xff]   ;;  %v1165_v46 = vld [vmem:[#allocation5 + $0x160] ss:$16 sps:$4 sm:$0xff]  }
  0x47   :  { %v1166_v47 = vld [vmem:[#allocation5 + $0x168] ss:$16 sps:$4 sm:$0xff]   ;;  %v945_v48 = vld.sshfl [vmem:[#allocation2] sm:$0x33 pattern:$0x76325410] }
  0x48   :  { %v1167_v49 = vld [vmem:[#allocation5 + $0x184] ss:$16 sps:$4 sm:$0xff]   ;;  %v70_v50 = vcombine.high %v945_v48, %v945_v48  ;;  %v1169_v51 = vld [vmem:[#allocation5 + $0x18c] ss:$16 sps:$4 sm:$0xff]   ;;  %v1171_v52 = vld [vmem:[#allocation5 + $0x180] ss:$16 sps:$4 sm:$0xff]   ;;  %v73_v6 = vpack.c.bf16 %v945_v48, %v945_v48 }
  0x49   :  { %490 = vmatpush1.bf16.msra.mxu0 %v1123_v18  ;;  %531 = vmatpush1.bf16.msra.mxu1 %v1124_v19  ;;  %v1172_v54 = vld [vmem:[#allocation5 + $0x188] ss:$16 sps:$4 sm:$0xff]   ;;  %v1173_v55 = vld [vmem:[#allocation5 + $0x1a4] ss:$16 sps:$4 sm:$0xff]   ;;  %v1175_v56 = vld [vmem:[#allocation5 + $0x1ac] ss:$16 sps:$4 sm:$0xff]  }
  0x4a   :  { %491 = vmatprep.subr.bf16.mxu0 %v1125_v20  ;;  %532 = vmatprep.subr.bf16.mxu1 %v1127_v21  ;;  %v74_v53 = vpack.c.bf16 %v70_v50, %v70_v50  ;;  %v1177_v57 = vld [vmem:[#allocation5 + $0x1a0] ss:$16 sps:$4 sm:$0xff]   ;;  %v1178_v58 = vld [vmem:[#allocation5 + $0x1a8] ss:$16 sps:$4 sm:$0xff]   ;;  %v1179_v59 = vld [vmem:[#allocation5 + $0x1c4] ss:$16 sps:$4 sm:$0xff]  }
  0x4b   :  { %v1181_v60 = vld [vmem:[#allocation5 + $0x1cc] ss:$16 sps:$4 sm:$0xff]   ;;  %v1183_v61 = vld [vmem:[#allocation5 + $0x1c0] ss:$16 sps:$4 sm:$0xff]   ;;  %v1184_v62 = vld [vmem:[#allocation5 + $0x1c8] ss:$16 sps:$4 sm:$0xff]  }
  0x4c   :  { %513 = vmatprep.mubr.bf16.mxu0 %v74_v53  ;;  %554 = vmatprep.mubr.bf16.mxu1 %v74_v53  ;;  %v1185_v63 = vld [vmem:[#allocation5 + $0x1e4] ss:$16 sps:$4 sm:$0xff]   ;;  %v1187_v0 = vld [vmem:[#allocation5 + $0x1ec] ss:$16 sps:$4 sm:$0xff]   ;;  %v1189_v1 = vld [vmem:[#allocation5 + $0x1e0] ss:$16 sps:$4 sm:$0xff]  }
  0x4d   :  { %492 = vmatpush1.bf16.msra.mxu0 %v1129_v22  ;;  %533 = vmatpush1.bf16.msra.mxu1 %v1130_v23  ;;  %v1190_v2 = vld [vmem:[#allocation5 + $0x1e8] ss:$16 sps:$4 sm:$0xff]   ;;  %v1191_v3 = vld [vmem:[#allocation7 + $0x40] sm:$0xff]   ;;  %v1199_v12 = vld [vmem:[#allocation7 + $0x50] sm:$0xff]   ;;  %vm914_vm0 = vcmask 1041408  }
  0x4e   :  { %493 = vmatprep.subr.bf16.mxu0 %v1131_v24  ;;  %534 = vmatprep.subr.bf16.mxu1 %v1133_v25  ;;  %v1192_v4 = vld [vmem:[#allocation7 + $0xc0] sm:$0xff]   ;;  %v1195_v8 = vld [vmem:[#allocation7 + $0x48] sm:$0xff]   ;;  %v1200_v13 = vld [vmem:[#allocation7 + $0xd0] sm:$0xff]  }
  0x4f   :  { %v1193_v5 = vld [vmem:[#allocation7] sm:$0xff]   ;;  %v1196_v9 = vld [vmem:[#allocation7 + $0xc8] sm:$0xff]   ;;  %v1201_v14 = vld [vmem:[#allocation7 + $0x10] sm:$0xff]  }
  0x50   :  { %v1194_v7 = vld [vmem:[#allocation7 + $0x80] sm:$0xff]   ;;  %v1197_v10 = vld [vmem:[#allocation7 + $0x8] sm:$0xff]   ;;  %v1202_v15 = vld [vmem:[#allocation7 + $0x90] sm:$0xff]  }
  0x51   :  { %494 = vmatpush1.bf16.msra.mxu0 %v1135_v26  ;;  %535 = vmatpush1.bf16.msra.mxu1 %v1136_v27  ;;  %v1198_v11 = vld [vmem:[#allocation7 + $0x88] sm:$0xff]   ;;  %v1203_v16 = vld [vmem:[#allocation7 + $0x58] sm:$0xff]   ;;  %v1207_v20 = vld [vmem:[#allocation7 + $0x60] sm:$0xff]  }
  0x52   :  { %495 = vmatprep.subr.bf16.mxu0 %v1137_v28  ;;  %536 = vmatprep.subr.bf16.mxu1 %v1139_v29  ;;  %v1204_v17 = vld [vmem:[#allocation7 + $0xd8] sm:$0xff]   ;;  %v1208_v21 = vld [vmem:[#allocation7 + $0xe0] sm:$0xff]   ;;  %v1211_v24 = vld [vmem:[#allocation7 + $0x68] sm:$0xff]  }
  0x53   :  { %v1205_v18 = vld [vmem:[#allocation7 + $0x18] sm:$0xff]   ;;  %v1209_v22 = vld [vmem:[#allocation7 + $0x20] sm:$0xff]   ;;  %v1212_v25 = vld [vmem:[#allocation7 + $0xe8] sm:$0xff]  }
  0x54   :  { %v1206_v19 = vld [vmem:[#allocation7 + $0x98] sm:$0xff]   ;;  %v1210_v23 = vld [vmem:[#allocation7 + $0xa0] sm:$0xff]   ;;  %v1213_v26 = vld [vmem:[#allocation7 + $0x28] sm:$0xff]  }
  0x55   :  { %496 = vmatpush1.bf16.msra.mxu0 %v1141_v30  ;;  %537 = vmatpush1.bf16.msra.mxu1 %v1142_v31  ;;  %v1214_v27 = vld [vmem:[#allocation7 + $0xa8] sm:$0xff]   ;;  %v1215_v28 = vld [vmem:[#allocation7 + $0x70] sm:$0xff]  }
  0x56   :  { %497 = vmatprep.subr.bf16.mxu0 %v1143_v32  ;;  %538 = vmatprep.subr.bf16.mxu1 %v1145_v33  ;;  %v1216_v29 = vld [vmem:[#allocation7 + $0xf0] sm:$0xff]   ;;  %v1219_v32 = vld [vmem:[#allocation7 + $0x78] sm:$0xff]  }
  0x57   :  { %v1217_v30 = vld [vmem:[#allocation7 + $0x30] sm:$0xff]   ;;  %v1220_v33 = vld [vmem:[#allocation7 + $0xf8] sm:$0xff]  }
  0x58   :  { %v1218_v31 = vld [vmem:[#allocation7 + $0xb0] sm:$0xff]  }
  0x59   :  { %498 = vmatpush1.bf16.msra.mxu0 %v1147_v34  ;;  %539 = vmatpush1.bf16.msra.mxu1 %v1148_v35  ;;  %v1221_v34 = vld [vmem:[#allocation7 + $0x38] sm:$0xff]  }
  0x5a   :  { %499 = vmatprep.subr.bf16.mxu0 %v1149_v36  ;;  %540 = vmatprep.subr.bf16.mxu1 %v1151_v37  ;;  %v1222_v35 = vld [vmem:[#allocation7 + $0xb8] sm:$0xff]   ;;  %v141_v36 = vlaneseq }
  0x5c   :  { %v142_v37 = vshrl.u32 %v141_v36, 7 }
  0x5d   :  { %500 = vmatpush1.bf16.msra.mxu0 %v1153_v38  ;;  %541 = vmatpush1.bf16.msra.mxu1 %v1154_v39 }
  0x5e   :  { %501 = vmatprep.subr.bf16.mxu0 %v1155_v40  ;;  %542 = vmatprep.subr.bf16.mxu1 %v1157_v41  ;;  %v143_v38 = vsub.s32 0, %v142_v37  ;;  %v151_v39 = vsub.s32 2, %v142_v37  ;;  %v139_v40 = vld [vmem:[%s1415_s2] sm:$0xf]  ;;  %v147_v41 = vsub.s32 1, %v142_v37 }
  0x61   :  { %502 = vmatpush1.bf16.msra.mxu0 %v1159_v42  ;;  %543 = vmatpush1.bf16.msra.mxu1 %v1160_v43  ;;  %v155_v42 = vsub.s32 3, %v142_v37  ;;  %v144_v43 = vrot.slane %v139_v40, %v143_v38 }
  0x62   :  { %503 = vmatprep.subr.bf16.mxu0 %v1161_v44  ;;  %544 = vmatprep.subr.bf16.mxu1 %v1163_v45  ;;  %v152_v44 = vrot.slane %v139_v40, %v151_v39  ;;  %v148_v45 = vrot.slane %v139_v40, %v147_v41 }
  0x65   :  { %504 = vmatpush1.bf16.msra.mxu0 %v1165_v46  ;;  %545 = vmatpush1.bf16.msra.mxu1 %v1166_v47  ;;  %v156_v46 = vrot.slane %v139_v40, %v155_v42 }
  0x66   :  { %505 = vmatprep.subr.bf16.mxu0 %v1167_v49  ;;  %546 = vmatprep.subr.bf16.mxu1 %v1169_v51 }
  0x69   :  { %506 = vmatpush1.bf16.msra.mxu0 %v1171_v52  ;;  %547 = vmatpush1.bf16.msra.mxu1 %v1172_v54 }
  0x6a   :  { %507 = vmatprep.subr.bf16.mxu0 %v1173_v55  ;;  %548 = vmatprep.subr.bf16.mxu1 %v1175_v56 }
  0x6d   :  { %508 = vmatpush1.bf16.msra.mxu0 %v1177_v57  ;;  %549 = vmatpush1.bf16.msra.mxu1 %v1178_v58 }
  0x6e   :  { %509 = vmatprep.subr.bf16.mxu0 %v1179_v59  ;;  %550 = vmatprep.subr.bf16.mxu1 %v1181_v60 }
  0x71   :  { %510 = vmatpush1.bf16.msra.mxu0 %v1183_v61  ;;  %551 = vmatpush1.bf16.msra.mxu1 %v1184_v62 }
  0x72   :  { %511 = vmatprep.subr.bf16.mxu0 %v1185_v63  ;;  %552 = vmatprep.subr.bf16.mxu1 %v1187_v0 }
  0x75   :  { %512 = vmatpush1.bf16.msra.mxu0 %v1189_v1  ;;  %553 = vmatpush1.bf16.msra.mxu1 %v1190_v2 }
  0x76   :  { %1043 = vmatprep.subr.bf16.mxu0 %v1191_v3  ;;  %1065 = vmatprep.subr.bf16.mxu1 %v1192_v4 }
  0x78   :  { %514 = vmatmul.mubr.bf16.vlgmr.msra.gmra.mrb[0].mxu0 %v73_v6  ;;  %555 = vmatmul.mubr.bf16.vlgmr.msra.gmra.mrb[0].mxu1 %v73_v6 }
  0x79   :  { %1044 = vmatpush3.bf16.msra.mxu0 %v1193_v5  ;;  %1066 = vmatpush3.bf16.msra.mxu1 %v1194_v7  ;;  %v1010_v5 = vld [vmem:[%s1417_s4] ss:$0 sm:$0xff]  ;;  %s1328_s4 = smov [#allocation8]  }
  0x7a   :  { %1045 = vmatprep.subr.bf16.mxu0 %v1195_v8  ;;  %1067 = vmatprep.subr.bf16.mxu1 %v1196_v9  ;;  %s935_s8 = sshll.u32 %s1328_s4, 4  ;;  %s936_s8 = int_to_ptr.vmem [resolvable:$true] %s935_s8 }
  0x7b   :  { %s1293_s9 = scalar_lea.vmem %s936_s8, 16  ;;  %s1297_s10 = scalar_lea.vmem %s936_s8, 32 }
  0x7c   :  { %p1294_p10 = scmp.ne.s32.totalorder %s936_s8, %s1293_s9  ;;  %p1298_p11 = scmp.lt.s32.totalorder %s936_s8, %s936_s8 }
  0x7d   :  { %1046 = vmatpush3.bf16.msra.mxu0 %v1197_v10  ;;  %1068 = vmatpush3.bf16.msra.mxu1 %v1198_v11  ;;  %p1299_p12 = scmp.lt.s32.totalorder %s1297_s10, %s1293_s9 }
  0x7e   :  { %1047 = vmatprep.subr.bf16.mxu0 %v1199_v12  ;;  %1069 = vmatprep.subr.bf16.mxu1 %v1200_v13 }
  0x7f   :  { %p1300_p13 = por %p1299_p12, %p1298_p11 }
  0x81   :  { %1048 = vmatpush3.bf16.msra.mxu0 %v1201_v14  ;;  %1070 = vmatpush3.bf16.msra.mxu1 %v1202_v15  ;;  %p1301_p0 = pnand %p1300_p13, %p1294_p10 }
  0x82   :  { %1049 = vmatprep.subr.bf16.mxu0 %v1203_v16  ;;  %1071 = vmatprep.subr.bf16.mxu1 %v1204_v17 }
  0x85   :  { %1050 = vmatpush3.bf16.msra.mxu0 %v1205_v18  ;;  %1072 = vmatpush3.bf16.msra.mxu1 %v1206_v19 }
  0x86   :  { %1051 = vmatprep.subr.bf16.mxu0 %v1207_v20  ;;  %1073 = vmatprep.subr.bf16.mxu1 %v1208_v21 }
  0x89   :  { %1052 = vmatpush3.bf16.msra.mxu0 %v1209_v22  ;;  %1074 = vmatpush3.bf16.msra.mxu1 %v1210_v23 }
  0x8a   :  { %1053 = vmatprep.subr.bf16.mxu0 %v1211_v24  ;;  %1075 = vmatprep.subr.bf16.mxu1 %v1212_v25 }
  0x8d   :  { %1054 = vmatpush3.bf16.msra.mxu0 %v1213_v26  ;;  %1076 = vmatpush3.bf16.msra.mxu1 %v1214_v27 }
  0x8e   :  { %1055 = vmatprep.subr.bf16.mxu0 %v1215_v28  ;;  %1077 = vmatprep.subr.bf16.mxu1 %v1216_v29 }
  0x91   :  { %1056 = vmatpush3.bf16.msra.mxu0 %v1217_v30  ;;  %1078 = vmatpush3.bf16.msra.mxu1 %v1218_v31 }
  0x92   :  { %1057 = vmatprep.subr.bf16.mxu0 %v1219_v32  ;;  %1079 = vmatprep.subr.bf16.mxu1 %v1220_v33 }
  0x95   :  { %1058 = vmatpush3.bf16.msra.mxu0 %v1221_v34  ;;  %1080 = vmatpush3.bf16.msra.mxu1 %v1222_v35 }
 0x14b   :  { %v515_v47 = vpop.f32.mrb[0].mxu0  ;;  %v556_v48 = vpop.f32.mrb[0].mxu1 }
 0x14c   :  { %v516_v49 = vadd.f32 %v515_v47, %v144_v43  ;;  %v557_v50 = vadd.f32 %v556_v48, %v152_v44  ;;  %v517_v51 = vpop.f32.mrb[1].mxu0  ;;  %v558_v52 = vpop.f32.mrb[1].mxu1 }
 0x14d   :  { %v518_v53 = vadd.f32 %v517_v51, %v148_v45  ;;  %v559_v54 = vadd.f32 %v558_v52, %v156_v46  ;;  %v519_v55 = vpop.f32.mrb[2].mxu0  ;;  %v560_v56 = vpop.f32.mrb[2].mxu1 }
 0x14e   :  { %v563_v57 = vmax.f32 %v516_v49, 0.0  ;;  %v565_v58 = vmax.f32 %v557_v50, 0.0  ;;  %v520_v59 = vpop.f32.mrb[3].mxu0  ;;  %v561_v60 = vpop.f32.mrb[3].mxu1 }
 0x14f   :  { %v564_v61 = vmax.f32 %v518_v53, 0.0  ;;  %v566_v62 = vmax.f32 %v559_v54, 0.0 }
 0x150   :  { %v569_v63 = vpack.c.bf16 %v565_v58, %v565_v58  ;;  %v567_v2 = vpack.c.bf16 %v563_v57, %v563_v57 }
 0x151   :  { %v568_v0 = vpack.c.bf16 %v564_v61, %v564_v61  ;;  %v570_v1 = vpack.c.bf16 %v566_v62, %v566_v62 }
 0x153   :  { %866 = vmatprep.mubr.bf16.mxu0 %v568_v0  ;;  %906 = vmatprep.mubr.bf16.mxu1 %v570_v1 }
 0x154   :  { %867 = vmatmul.mubr.bf16.vlgmr.msra.gmra.mrb[4].mxu0 %v567_v2  ;;  %907 = vmatmul.mubr.bf16.vlgmr.msra.gmra.mrb[4].mxu1 %v569_v63 }
 0x227   :  { %v1059_v3 = vpop.f32.mrb[4].mxu0  ;;  %v1081_v4 = vpop.f32.mrb[4].mxu1 }
 0x228   :  { %v1060_v6 = vpop.f32.mrb[5].mxu0  ;;  %v1082_v7 = vpop.f32.mrb[5].mxu1 }
 0x229   :  { %v1061_v8 = vadd.f32 %v1060_v6, %v1059_v3  ;;  %v1083_v9 = vadd.f32 %v1082_v7, %v1081_v4  ;;  %v1062_v10 = vpop.f32.mrb[6].mxu0  ;;  %v1084_v11 = vpop.f32.mrb[6].mxu1 }
 0x22a   :  { %v1063_v12 = vpop.f32.mrb[7].mxu0  ;;  %v1085_v13 = vpop.f32.mrb[7].mxu1 }
 0x22b   :  { %v869_v14 = vadd.f32 %v1061_v8, %v1010_v5 }
 0x22d   :  { %v909_v15 = vadd.f32 %v1083_v9, %v869_v14 }
 0x22f   :  { %v915_v16 = vsel %vm914_vm0, %v909_v15, -inf }
 0x230   :  { %916 = vmax.xlane.f32.xlu0 %v915_v16 }
 0x2bd   :  { %v917_v17 = vpop.xlane.xlu0 %916 }
 0x2be   :  { %v918_v18 = vsub.f32 %v909_v15, %v917_v17 }
 0x2c0   :  { %v919_v19 = vmul.f32 1.442695, %v918_v18 }
 0x2c2   :  { %1223 = vpow2.f32 %v919_v19 }
 0x2cc   :  { %v1224_v20 = vpop.eup %1223 }
 0x2cd   :  { %v921_v21 = vsel %vm914_vm0, %v1224_v20, 0.0 }
 0x2ce   :  { %922 = vadd.xlane.f32.xlu0 %v921_v21 }
 0x35b   :  { %v923_v22 = vpop.xlane.xlu0 %922 }
 0x35c   :  { %1225 = vlog2.f32 %v923_v22 }
 0x366   :  { %v1226_v23 = vpop.eup %1225 }
 0x367   :  { %v925_v24 = vmul.f32 0.6931472, %v1226_v23 }
 0x369   :  { %v926_v25 = vsub.f32 %v918_v18, %v925_v24 }
 0x36b   :  { %v927_v26 = vpack.c.bf16 %v926_v25, %v926_v25 }
 0x36d   :  { %928 = vst [vmem:[#allocation8] sm:$0x1] %v927_v26 }
 0x36e   :  { %1304 = shalt.err (!%p1301_p0)
}
 0x36f   :  { %s1305_s13 = scalar_lea.hbm %s1418_s5, 16 }
 0x370   :  { %p1306_p1 = scmp.ne.s32.totalorder %s1418_s5, %s1305_s13  ;;  %p1309_p2 = scmp.lt.u32.totalorder %s1305_s13, %s1418_s5 }
 0x372   :  { %p1311_p3 = pnand %p1309_p2, %p1306_p1 }
 0x374   :  { %1314 = shalt.err (!%p1311_p3)
}
 0x375   :  { %938 = dma.vmem_to_hbm [thread:$0]  %s936_s8, 16, %s1418_s5, [#allocation4]  }
 0x376   :  { %1319 = dma.done.wait [#allocation4], 16  }
 0x377   :  { %1320 = vsyncadd [#allocation4], 4294967280 }
 0x378   :  { %942 = vsyncpa [#allocation3], 1 }
 0x379   :  { %943 = vsyncpa [#allocation6], 1 }
 0x37a   :  { %944 = vsyncpa [#allocation4], 1 }

</bundles_post_ra>
